<compile_context>
chip_gen: v7x
topology: tpu7x:2x2x1
jax: 0.10.0
libtpu: 0.0.40
codegen_flags: <defaults>
</compile_context>

<pallas_src>
import functools

import numpy as np

import jax
import jax.numpy as jnp
from jax.experimental import pallas as pl
from jax.experimental.pallas import tpu as pltpu


MARGIN = 0.5
EPS = 1e-12  # F.normalize default eps


def _cdiv(a, b):
    return -(-a // b)


def _pick_block_rows(num_triplets, feat_dim, itemsize):
    """Triplet rows per tile: ~2 MiB per input buffer, multiple of 8."""
    target_bytes = 2 * 1024 * 1024
    tm = target_bytes // max(1, 3 * feat_dim * itemsize)
    tm = int(max(8, min(1024, tm)))
    tm -= tm % 8
    if tm >= num_triplets:
        return num_triplets        # single tile == full array extent
    return max(8, tm)


def _metric_triplet_kernel(x_ref, o_ref, *, margin, eps, feat_dim,
                           num_triplets, block_rows, blocks_per_split):
    """Accumulates sum(relu(margin + ||a^-p^||^2 - ||a^-n^||^2)) per core split.

    x_ref: (block_rows, 3*feat_dim) tile, rows = [anchor | positive | negative]
    o_ref: (1, 1, 1) float32 partial sum for this core split (resident across
           the "arbitrary" tile axis; zero-initialized at j == 0).
    """
    c = pl.program_id(0)           # core-split index ("parallel")
    j = pl.program_id(1)           # tile index within the split ("arbitrary")

    @pl.when(j == 0)
    def _init():
        o_ref[...] = jnp.zeros_like(o_ref)

    d = feat_dim
    a = x_ref[:, pl.ds(0 * d, d)].astype(jnp.float32)   # anchors    (TM, D)
    p = x_ref[:, pl.ds(1 * d, d)].astype(jnp.float32)   # positives  (TM, D)
    n = x_ref[:, pl.ds(2 * d, d)].astype(jnp.float32)   # negatives  (TM, D)

    # One pass of per-row dot products / squared norms over the tile.
    sa = jnp.sum(a * a, axis=-1, keepdims=True)          # (TM, 1)
    sp = jnp.sum(p * p, axis=-1, keepdims=True)
    sn = jnp.sum(n * n, axis=-1, keepdims=True)
    dap = jnp.sum(a * p, axis=-1, keepdims=True)
    dan = jnp.sum(a * n, axis=-1, keepdims=True)

    # F.normalize(x, 2, 1) divides by max(||x||, eps).  With
    #   inv = rsqrt(max(||x||^2, eps^2))
    # the normalized squared euclidean distance is exactly
    #   ||a^-b^||^2 = sa*inv_a^2 + sb*inv_b^2 - 2*(a.b)*inv_a*inv_b
    # (equivalent to the PyTorch path, including all-zero rows).
    eps2 = eps * eps
    inv_a = jax.lax.rsqrt(jnp.maximum(sa, eps2))
    inv_p = jax.lax.rsqrt(jnp.maximum(sp, eps2))
    inv_n = jax.lax.rsqrt(jnp.maximum(sn, eps2))

    naa = sa * inv_a * inv_a
    npp = sp * inv_p * inv_p
    nnn = sn * inv_n * inv_n
    d_ap = naa + npp - 2.0 * (dap * (inv_a * inv_p))
    d_an = naa + nnn - 2.0 * (dan * (inv_a * inv_n))

    hinge = jnp.maximum(margin + d_ap - d_an, 0.0)        # (TM, 1)

    # Mask rows past the true triplet count: ragged last tile and any
    # duplicated (index-clamped) tiles on the spare core split. jnp.where
    # keeps garbage/NaN from padded rows out of the sum.
    tile_idx = c * blocks_per_split + j
    row = tile_idx * block_rows + jax.lax.broadcasted_iota(
        jnp.int32, hinge.shape, 0)
    valid = row < num_triplets
    o_ref[...] += jnp.sum(jnp.where(valid, hinge, 0.0))


def metric_loss_triplet(x, targets=None, margin=MARGIN, block_rows=None,
                        num_core_splits=2):
    """Pallas implementation of MetricLoss(default config).forward(x, targets).

    x:       (B, D) float array (f32 or bf16), B divisible by 3, rows ordered
             as [anchor, positive, negative] triplets (same convention as the
             PyTorch module).
    targets: accepted for API parity; not used on-device. Use
             validate_triplet_targets(targets) offline / in debug mode (the
             blocking host-sync asserts were removed from the hot path so the
             wrapper is jit-friendly).
    returns: scalar float32 loss.
    """
    del targets  # sampling validity is checked offline, not in the hot path
    B, D = x.shape
    if B % 3 != 0:
        raise ValueError("triplet sampling requires batch % 3 == 0")
    T = B // 3

    # Free, row-major reshape: row t = [anchor_t | positive_t | negative_t].
    x3 = x.reshape(T, 3 * D)

    if block_rows is None:
        block_rows = _pick_block_rows(T, D, jnp.dtype(x.dtype).itemsize)
    nb = _cdiv(T, block_rows)                     # tiles of triplet rows
    ns = max(1, min(int(num_core_splits), nb))    # core splits (v7x megacore)
    nbp = _cdiv(nb, ns)                           # tiles per split

    kernel = functools.partial(
        _metric_triplet_kernel, margin=float(margin), eps=float(EPS),
        feat_dim=D, num_triplets=T, block_rows=block_rows,
        blocks_per_split=nbp)

    # Input: one contiguous (block_rows, 3*D) tile per grid step; clamp the
    # block index so the spare split's overhang re-reads the last valid tile
    # (its rows are masked out inside the kernel).
    in_spec = pl.BlockSpec(
        (block_rows, 3 * D),
        lambda c, j: (jnp.minimum(c * nbp + j, nb - 1), 0))
    # Output: one (1,1,1) partial-sum block per core split, resident across j.
    out_spec = pl.BlockSpec((1, 1, 1), lambda c, j: (c, 0, 0))

    partials = pl.pallas_call(
        kernel,
        out_shape=jax.ShapeDtypeStruct((ns, 1, 1), jnp.float32),
        grid=(ns, nbp),
        in_specs=[in_spec],
        out_specs=out_spec,
        compiler_params=pltpu.CompilerParams(
            dimension_semantics=("parallel", "arbitrary")),
    )(x3)
    return jnp.sum(partials) / T


def validate_triplet_targets(targets):
    """Host-side, debug-only mirror of the PyTorch sampling asserts."""
    t = np.asarray(jax.device_get(targets))
    assert t.size % 3 == 0, "triplet sampling requires batch % 3 == 0"
    assert np.unique(t).size < t.size, \
        "MetricLoss: Requires multiple samples per label in a batch."
    assert (np.all(t[0::3] == t[1::3]) and np.all(t[0::3] != t[2::3])
            and np.all(t[1::3] != t[2::3])), "expected triplet-sampled targets"


def metric_loss_triplet_ref(x, margin=MARGIN):
    """Pure-JAX reference identical to the PyTorch default fast path."""
    x = x.astype(jnp.float32)
    nrm = jnp.sqrt(jnp.sum(x * x, axis=1, keepdims=True))
    xn = x / jnp.maximum(nrm, EPS)
    a, p, n = xn[0::3], xn[1::3], xn[2::3]
    d_ap = jnp.sum((a - p) ** 2, axis=1)
    d_an = jnp.sum((a - n) ** 2, axis=1)
    return jnp.mean(jnp.maximum(margin + d_ap - d_an, 0.0))


def _make_triplet_targets(num_triplets):
    t = np.zeros(3 * num_triplets, dtype=np.int32)
    labels = np.arange(num_triplets, dtype=np.int32)
    t[0::3] = labels
    t[1::3] = labels
    t[2::3] = (labels + 1) % num_triplets
    return jnp.asarray(t)


if __name__ == "__main__":
    key = jax.random.PRNGKey(0)
    k1, k2 = jax.random.split(key)

    loss_fn = jax.jit(
        metric_loss_triplet,
        static_argnames=("margin", "block_rows", "num_core_splits"))

    # Case 1: lane-dense features (D multiple of 128), single tile, f32.
    B1, D1 = 24, 128                       # 8 triplets
    x1 = jax.random.normal(k1, (B1, D1), dtype=jnp.float32)
    t1 = _make_triplet_targets(B1 // 3)
    validate_triplet_targets(t1)           # debug-only, outside the hot path
    out1 = jax.block_until_ready(loss_fn(x1, t1))
    ref1 = jax.block_until_ready(metric_loss_triplet_ref(x1))
    assert jnp.allclose(out1, ref1, atol=1e-5, rtol=1e-5), (out1, ref1)

    # Case 2: small D, multiple tiles, ragged last tile, both core splits
    # (nb=3 tiles -> split 1 exercises the clamped duplicate tile + masking).
    B2, D2 = 60, 32                        # 20 triplets, tiles of 8
    x2 = jax.random.normal(k2, (B2, D2), dtype=jnp.float32)
    t2 = _make_triplet_targets(B2 // 3)
    out2 = jax.block_until_ready(loss_fn(x2, t2, block_rows=8))
    ref2 = jax.block_until_ready(metric_loss_triplet_ref(x2))
    assert jnp.allclose(out2, ref2, atol=1e-5, rtol=1e-5), (out2, ref2)

    # Case 3: bf16 features stream at native width; f32 math inside kernel.
    x1_bf16 = x1.astype(jnp.bfloat16)
    out3 = jax.block_until_ready(loss_fn(x1_bf16, t1))
    ref3 = jax.block_until_ready(metric_loss_triplet_ref(x1_bf16))
    assert jnp.allclose(out3, ref3, atol=1e-4, rtol=1e-4), (out3, ref3)

    print("KERNEL_OK")
</pallas_src>

<mosaic_0001>
module attributes {stable_mosaic.version = 11 : i64} {
  func.func @_metric_triplet_kernel(%arg0: i32, %arg1: i32, %arg2: memref<8x384xf32, #tpu.memory_space<vmem>>, %arg3: memref<1x1x1xf32, #tpu.memory_space<vmem>>) attributes {dimension_semantics = [#tpu.dimension_semantics<parallel>, #tpu.dimension_semantics<arbitrary>], iteration_bounds = array<i64: 1, 1>, scalar_prefetch = 0 : i64, scratch_operands = 0 : i64, tpu.core_type = #tpu.core_type<tc>, window_params = [{transform_indices = @transform_0, window_bounds = array<i64: 8, 384>}, {transform_indices = @transform_1, window_bounds = array<i64: 1, 1, 1>}]} {
    %c0_i32 = arith.constant 0 : i32
    %0 = arith.cmpi eq, %arg1, %c0_i32 : i32
    %1 = arith.extui %0 : i1 to i32
    %c0_i32_0 = arith.constant 0 : i32
    %2 = arith.cmpi ne, %1, %c0_i32_0 : i32
    scf.if %2 {
      %cst_24 = arith.constant 0.000000e+00 : f32
      %71 = vector.broadcast %cst_24 : f32 to vector<1x1x1xf32>
      %c0_25 = arith.constant 0 : index
      %c0_26 = arith.constant 0 : index
      %c0_27 = arith.constant 0 : index
      %72 = vector.load %arg3[%c0_25, %c0_26, %c0_27] : memref<1x1x1xf32, #tpu.memory_space<vmem>>, vector<1x1x1xf32>
      tpu.vector_store %arg3[%c0_25, %c0_26, %c0_27], %71 {strides = array<i32>} : memref<1x1x1xf32, #tpu.memory_space<vmem>>, vector<1x1x1xf32>,
    } else {
    }
    %c0 = arith.constant 0 : index
    %c0_1 = arith.constant 0 : index
    %3 = vector.load %arg2[%c0, %c0_1] : memref<8x384xf32, #tpu.memory_space<vmem>>, vector<8x128xf32>
    %c0_2 = arith.constant 0 : index
    %c128 = arith.constant 128 : index
    %4 = vector.load %arg2[%c0_2, %c128] : memref<8x384xf32, #tpu.memory_space<vmem>>, vector<8x128xf32>
    %c0_3 = arith.constant 0 : index
    %c256 = arith.constant 256 : index
    %5 = vector.load %arg2[%c0_3, %c256] : memref<8x384xf32, #tpu.memory_space<vmem>>, vector<8x128xf32>
    %6 = arith.mulf %3, %3 : vector<8x128xf32>
    %cst = arith.constant dense<0.000000e+00> : vector<8xf32>
    %7 = vector.multi_reduction <add>, %6, %cst [1] : vector<8x128xf32> to vector<8xf32>
    %8 = vector.shape_cast %7 : vector<8xf32> to vector<8x1xf32>
    %9 = arith.mulf %4, %4 : vector<8x128xf32>
    %cst_4 = arith.constant dense<0.000000e+00> : vector<8xf32>
    %10 = vector.multi_reduction <add>, %9, %cst_4 [1] : vector<8x128xf32> to vector<8xf32>
    %11 = vector.shape_cast %10 : vector<8xf32> to vector<8x1xf32>
    %12 = arith.mulf %5, %5 : vector<8x128xf32>
    %cst_5 = arith.constant dense<0.000000e+00> : vector<8xf32>
    %13 = vector.multi_reduction <add>, %12, %cst_5 [1] : vector<8x128xf32> to vector<8xf32>
    %14 = vector.shape_cast %13 : vector<8xf32> to vector<8x1xf32>
    %15 = arith.mulf %3, %4 : vector<8x128xf32>
    %cst_6 = arith.constant dense<0.000000e+00> : vector<8xf32>
    %16 = vector.multi_reduction <add>, %15, %cst_6 [1] : vector<8x128xf32> to vector<8xf32>
    %17 = vector.shape_cast %16 : vector<8xf32> to vector<8x1xf32>
    %18 = arith.mulf %3, %5 : vector<8x128xf32>
    %cst_7 = arith.constant dense<0.000000e+00> : vector<8xf32>
    %19 = vector.multi_reduction <add>, %18, %cst_7 [1] : vector<8x128xf32> to vector<8xf32>
    %20 = vector.shape_cast %19 : vector<8xf32> to vector<8x1xf32>
    %cst_8 = arith.constant 1.000000e-24 : f32
    %21 = vector.broadcast %cst_8 : f32 to vector<8x1xf32>
    %22 = arith.maximumf %8, %21 : vector<8x1xf32>
    %23 = math.rsqrt %22 : vector<8x1xf32>
    %cst_9 = arith.constant 1.000000e-24 : f32
    %24 = vector.broadcast %cst_9 : f32 to vector<8x1xf32>
    %25 = arith.maximumf %11, %24 : vector<8x1xf32>
    %26 = math.rsqrt %25 : vector<8x1xf32>
    %cst_10 = arith.constant 1.000000e-24 : f32
    %27 = vector.broadcast %cst_10 : f32 to vector<8x1xf32>
    %28 = arith.maximumf %14, %27 : vector<8x1xf32>
    %29 = math.rsqrt %28 : vector<8x1xf32>
    %30 = arith.mulf %8, %23 : vector<8x1xf32>
    %31 = arith.mulf %30, %23 : vector<8x1xf32>
    %32 = arith.mulf %11, %26 : vector<8x1xf32>
    %33 = arith.mulf %32, %26 : vector<8x1xf32>
    %34 = arith.mulf %14, %29 : vector<8x1xf32>
    %35 = arith.mulf %34, %29 : vector<8x1xf32>
    %36 = arith.addf %31, %33 : vector<8x1xf32>
    %37 = arith.mulf %23, %26 : vector<8x1xf32>
    %38 = arith.mulf %17, %37 : vector<8x1xf32>
    %cst_11 = arith.constant 2.000000e+00 : f32
    %39 = vector.broadcast %cst_11 : f32 to vector<8x1xf32>
    %40 = arith.mulf %39, %38 : vector<8x1xf32>
    %41 = arith.subf %36, %40 : vector<8x1xf32>
    %42 = arith.addf %31, %35 : vector<8x1xf32>
    %43 = arith.mulf %23, %29 : vector<8x1xf32>
    %44 = arith.mulf %20, %43 : vector<8x1xf32>
    %cst_12 = arith.constant 2.000000e+00 : f32
    %45 = vector.broadcast %cst_12 : f32 to vector<8x1xf32>
    %46 = arith.mulf %45, %44 : vector<8x1xf32>
    %47 = arith.subf %42, %46 : vector<8x1xf32>
    %cst_13 = arith.constant 5.000000e-01 : f32
    %48 = vector.broadcast %cst_13 : f32 to vector<8x1xf32>
    %49 = arith.addf %48, %41 : vector<8x1xf32>
    %50 = arith.subf %49, %47 : vector<8x1xf32>
    %cst_14 = arith.constant 0.000000e+00 : f32
    %51 = vector.broadcast %cst_14 : f32 to vector<8x1xf32>
    %52 = arith.maximumf %50, %51 : vector<8x1xf32>
    %c1_i32 = arith.constant 1 : i32
    %53 = arith.muli %arg0, %c1_i32 : i32
    %54 = arith.addi %53, %arg1 : i32
    %c8_i32 = arith.constant 8 : i32
    %55 = arith.muli %54, %c8_i32 : i32
    %56 = tpu.iota {dimensions = array<i32: 0>} : vector<8x1xi32>
    %57 = vector.broadcast %55 : i32 to vector<8x1xi32>
    %58 = arith.addi %57, %56 : vector<8x1xi32>
    %c8_i32_15 = arith.constant 8 : i32
    %59 = vector.broadcast %c8_i32_15 : i32 to vector<8x1xi32>
    %60 = arith.cmpi slt, %58, %59 : vector<8x1xi32>
    %c0_16 = arith.constant 0 : index
    %c0_17 = arith.constant 0 : index
    %c0_18 = arith.constant 0 : index
    %61 = vector.load %arg3[%c0_16, %c0_17, %c0_18] : memref<1x1x1xf32, #tpu.memory_space<vmem>>, vector<1x1x1xf32>
    %cst_19 = arith.constant 0.000000e+00 : f32
    %62 = vector.broadcast %cst_19 : f32 to vector<8x1xf32>
    %63 = arith.select %60, %52, %62 : vector<8x1xi1>, vector<8x1xf32>
    %64 = vector.shape_cast %63 : vector<8x1xf32> to vector<1x8x1xf32>
    %cst_20 = arith.constant dense<0.000000e+00> : vector<1xf32>
    %65 = vector.multi_reduction <add>, %64, %cst_20 [1, 2] : vector<1x8x1xf32> to vector<1xf32>
    %66 = vector.shape_cast %65 : vector<1xf32> to vector<1x1x1xf32>
    %67 = vector.extract %66[0, 0, 0] : f32 from vector<1x1x1xf32>
    %68 = vector.broadcast %67 : f32 to vector<1x1x1xf32>
    %69 = arith.addf %61, %68 : vector<1x1x1xf32>
    %c0_21 = arith.constant 0 : index
    %c0_22 = arith.constant 0 : index
    %c0_23 = arith.constant 0 : index
    %70 = vector.load %arg3[%c0_21, %c0_22, %c0_23] : memref<1x1x1xf32, #tpu.memory_space<vmem>>, vector<1x1x1xf32>
    tpu.vector_store %arg3[%c0_21, %c0_22, %c0_23], %69 {strides = array<i32>} : memref<1x1x1xf32, #tpu.memory_space<vmem>>, vector<1x1x1xf32>,
    return
  }
  func.func @transform_0(%arg0: i32, %arg1: i32) -> (i32, i32) {
    %c1_i32 = arith.constant 1 : i32
    %0 = arith.muli %arg0, %c1_i32 : i32
    %1 = arith.addi %0, %arg1 : i32
    %c0_i32 = arith.constant 0 : i32
    %2 = arith.minsi %1, %c0_i32 : i32
    %c0_i32_0 = arith.constant 0 : i32
    %c0_i32_1 = arith.constant 0 : i32
    return %2, %c0_i32_0 : i32, i32
  }
  func.func @transform_1(%arg0: i32, %arg1: i32) -> (i32, i32, i32) {
    %c0_i32 = arith.constant 0 : i32
    %c0_i32_0 = arith.constant 0 : i32
    %c0_i32_1 = arith.constant 0 : i32
    return %arg0, %c0_i32, %c0_i32_0 : i32, i32, i32
  }
}

</mosaic_0001>

<bundles_post_ra>
// kernel: metric_loss_triplet.1
= control target key start
LH: loop header
LB: loop body
LE: loop exit
PB: predicated region body
PF: predicated region fallthrough
CT: control target
= control target key end

     0   :  { %s201_s0 = inlined_call_operand.vmem [shape: f32[8,384], index: 0, kind: input, shape index: {}]   ;;  %s202_s1 = inlined_call_operand.hbm [shape: f32[1,1,1], index: 1, kind: output, shape index: {}]  }
   0x1   :  { %v47_v0 = vld [vmem:[%s201_s0 + $0x10] sm:$0xff]  ;;  %v45_v1 = vld [vmem:[%s201_s0] sm:$0xff]  ;;  %v46_v2 = vld [vmem:[%s201_s0 + $0x8] sm:$0xff] }
   0x2   :  { %v54_v3 = vmul.f32 %v47_v0, %v47_v0  ;;  %v48_v4 = vmul.f32 %v45_v1, %v45_v1 }
   0x3   :  { %6 = vsyncpa [#allocation3], 0  ;;  %v51_v5 = vmul.f32 %v46_v2, %v46_v2  ;;  %v57_v6 = vmul.f32 %v46_v2, %v45_v1  ;;  %v60_v7 = vmul.f32 %v47_v0, %v45_v1  ;;  %vm97_vm0 = vcmask 7168   ;;  %s167_s0 = smov [#allocation2]  }
   0x4   :  { %55 = vadd.xlane.f32.xlu1 %v54_v3  ;;  %49 = vadd.xlane.f32.xlu0 %v48_v4  ;;  %vm43_vm1 = vcmask 0   ;;  %v166_v39 = vmov 0.0   ;;  %s118_s12 = sshll.u32 %s167_s0, 4  ;;  %s119_s12 = int_to_ptr.vmem [resolvable:$true] %s118_s12 }
   0x5   :  { %44 = vst.msk [vmem:[#allocation2] sm:$0x1] %vm43_vm1, %v166_v39  ;;  %s142_s14 = scalar_lea.vmem %s119_s12, 16  ;;  %s146_s15 = scalar_lea.vmem %s119_s12, 32 }
   0x6   :  { %p143_p0 = scmp.ne.s32.totalorder %s119_s12, %s142_s14  ;;  %p147_p1 = scmp.lt.s32.totalorder %s119_s12, %s119_s12 }
   0x7   :  { %p148_p2 = scmp.lt.s32.totalorder %s146_s15, %s142_s14 }
   0x8   :  { %52 = vadd.xlane.f32.xlu0 %v51_v5  ;;  %58 = vadd.xlane.f32.xlu1 %v57_v6 }
   0x9   :  { %p149_p3 = por %p148_p2, %p147_p1 }
   0xb   :  { %p150_p4 = pnand %p149_p3, %p143_p0 }
   0xc   :  { %61 = vadd.xlane.f32.xlu0 %v60_v7  ;;  %v95_v47 = vld [vmem:[#allocation2] sm:$0x1] }
  0x91   :  { %v56_v8 = vpop.xlane.xlu1 %55  ;;  %v50_v9 = vpop.xlane.xlu0 %49 }
  0x92   :  { %v67_v10 = vmax.f32 %v56_v8, 1e-24  ;;  %v63_v11 = vmax.f32 %v50_v9, 1e-24 }
  0x94   :  { %136 = vrsqrt.f32 %v67_v10 }
  0x95   :  { %138 = vrsqrt.f32 %v63_v11  ;;  %v53_v12 = vpop.xlane.xlu0 %52  ;;  %v59_v22 = vpop.xlane.xlu1 %58 }
  0x96   :  { %v65_v13 = vmax.f32 %v53_v12, 1e-24 }
  0x98   :  { %140 = vrsqrt.f32 %v65_v13 }
  0x99   :  { %v62_v19 = vpop.xlane.xlu0 %61 }
  0x9e   :  { %v137_v14 = vpop.eup %136 }
  0x9f   :  { %v139_v15 = vpop.eup %138  ;;  %v73_v16 = vmul.f32 %v137_v14, %v56_v8 }
  0xa0   :  { %v69_v17 = vmul.f32 %v139_v15, %v50_v9  ;;  %v81_v18 = vmul.f32 %v139_v15, %v137_v14 }
  0xa1   :  { %v74_v21 = vmul.f32 %v137_v14, %v73_v16 }
  0xa2   :  { %v141_v20 = vpop.eup %140  ;;  %v70_v23 = vmul.f32 %v139_v15, %v69_v17  ;;  %v82_v25 = vmul.f32 %v81_v18, %v62_v19 }
  0xa3   :  { %v71_v24 = vmul.f32 %v141_v20, %v53_v12  ;;  %v76_v26 = vmul.f32 %v141_v20, %v139_v15 }
  0xa4   :  { %v80_v29 = vadd.f32 %v74_v21, %v70_v23  ;;  %v83_v30 = vmul.f32 2.0, %v82_v25 }
  0xa5   :  { %v72_v27 = vmul.f32 %v141_v20, %v71_v24  ;;  %v77_v28 = vmul.f32 %v76_v26, %v59_v22 }
  0xa6   :  { %v84_v34 = vsub.f32 %v80_v29, %v83_v30 }
  0xa7   :  { %v75_v31 = vadd.f32 %v72_v27, %v70_v23  ;;  %v78_v32 = vmul.f32 2.0, %v77_v28 }
  0xa9   :  { %v79_v33 = vsub.f32 %v75_v31, %v78_v32 }
  0xab   :  { %v85_v35 = vadd.f32 0.5, %v79_v33 }
  0xad   :  { %v86_v36 = vsub.f32 %v85_v35, %v84_v34 }
  0xaf   :  { %v87_v37 = vmax.f32 %v86_v36, 0.0 }
  0xb1   :  { %v98_v38 = vsel %vm97_vm0, %v87_v37, 0.0 }
  0xb2   :  { %99 = vadd.xlane.f32.xlu1 %v98_v38 }
 0x13f   :  { %v100_v40 = vpop.xlane.xlu1 %99 }
 0x140   :  { %v101_v41 = vrot.slane %v100_v40, 4 }
 0x142   :  { %v102_v42 = vadd.f32 %v101_v41, %v100_v40 }
 0x144   :  { %v103_v43 = vrot.slane %v102_v42, 2 }
 0x146   :  { %v104_v44 = vadd.f32 %v103_v43, %v102_v42 }
 0x148   :  { %v105_v45 = vrot.slane %v104_v44, 1 }
 0x14a   :  { %v106_v46 = vadd.f32 %v105_v45, %v104_v44 }
 0x14c   :  { %132 = vpush %v106_v46 }
 0x17d   :  { %s133_s13 = spop %132 }
 0x17e   :  { %v108_v48 = vstv %s133_s13 }
 0x17f   :  { %v109_v49 = vadd.f32 %v108_v48, %v95_v47 }
 0x181   :  { %111 = vst.msk [vmem:[#allocation2] sm:$0x1] %vm43_vm1, %v109_v49 }
 0x182   :  { %153 = shalt.err (!%p150_p4)
}
 0x183   :  { %s154_s18 = scalar_lea.hbm %s202_s1, 16 }
 0x184   :  { %p155_p5 = scmp.ne.s32.totalorder %s202_s1, %s154_s18  ;;  %p158_p6 = scmp.lt.u32.totalorder %s154_s18, %s202_s1 }
 0x186   :  { %p160_p7 = pnand %p158_p6, %p155_p5 }
 0x188   :  { %163 = shalt.err (!%p160_p7)
}
 0x189   :  { %121 = dma.vmem_to_hbm [thread:$0]  %s119_s12, 16, %s202_s1, [#allocation3]  }
 0x18a   :  { %164 = dma.done.wait [#allocation3], 16  }
 0x18b   :  { %165 = vsyncadd [#allocation3], 4294967280 }
 0x18c   :  { %125 = vsyncpa [#allocation3], 1 }

</bundles_post_ra>
